<compile_context>
chip_gen: v6e
topology: v6e:2x2x1
jax: 0.10.0
libtpu: 0.0.40
codegen_flags: <defaults>
</compile_context>

<pallas_src>
import jax
import jax.numpy as jnp
from jax.experimental import pallas as pl
from jax.experimental.pallas import tpu as pltpu


def _round_up(a: int, b: int) -> int:
    return (a + b - 1) // b * b


def _make_kernel(num_classes: int, epsilon: float):
    keep = 1.0 - float(epsilon)
    smooth_w = float(epsilon) / float(num_classes)

    def kernel(logits_ref, targets_ref, loss_ref):
        x = logits_ref[...].astype(jnp.float32)                 # (TILE_N, C_pad)
        t = targets_ref[...]                                    # (TILE_N, 1) int32

        class_ids = jax.lax.broadcasted_iota(jnp.int32, x.shape, 1)
        valid_c = class_ids < num_classes                       # mask padded classes

        # --- log-softmax pieces over the (masked) class axis ---
        m = jnp.max(jnp.where(valid_c, x, -3.0e38), axis=1, keepdims=True)
        e = jnp.where(valid_c, jnp.exp(x - m), 0.0)
        lse = jnp.log(jnp.sum(e, axis=1, keepdims=True))
        mle = m + lse                                           # log-sum-exp of raw logits

        # log_prob[n, c] = x[n, c] - mle[n]; only two reductions of it are needed.
        tgt_x = jnp.sum(jnp.where(class_ids == t, x, 0.0), axis=1, keepdims=True)
        target_lp = tgt_x - mle                                 # log_prob at the target
        sum_x = jnp.sum(jnp.where(valid_c, x, 0.0), axis=1, keepdims=True)
        row_sum_lp = sum_x - jnp.float32(num_classes) * mle     # sum_c log_prob[n, c]

        # per-row smoothed CE (un-normalized); wrapper applies the true 1/N
        loss_ref[...] = -(keep * target_lp + smooth_w * row_sum_lp)

    return kernel


def cross_entropy_label_smooth(logits, targets, num_classes: int, epsilon: float,
                               tile_rows: int | None = None):
    """logits: (N, C) float (f32/bf16); targets: (N,) int class ids. Returns scalar f32."""
    n, c = logits.shape
    assert c == num_classes

    # Lane-dense class axis.
    c_pad = max(128, _round_up(c, 128))

    # Batch tile sized so one double-buffered logits tile stays ~<= 12 MiB.
    if tile_rows is None:
        itemsize = jnp.dtype(logits.dtype).itemsize
        budget_per_buffer = 6 * 1024 * 1024
        tile_n = budget_per_buffer // (c_pad * itemsize)
        tile_n = max(8, min(1024, (tile_n // 8) * 8))
    else:
        tile_n = max(8, _round_up(tile_rows, 8))
    tile_n = min(tile_n, _round_up(n, 8))
    num_tiles = pl.cdiv(n, tile_n)
    n_pad = num_tiles * tile_n

    # Zero-padding keeps padded rows finite (their loss rows are sliced off below).
    logits_p = jnp.pad(logits, ((0, n_pad - n), (0, c_pad - c)))
    targets_p = jnp.pad(targets.astype(jnp.int32), (0, n_pad - n)).reshape(n_pad, 1)

    row_losses = pl.pallas_call(
        _make_kernel(num_classes, epsilon),
        out_shape=jax.ShapeDtypeStruct((n_pad, 1), jnp.float32),
        grid=(num_tiles,),
        in_specs=[
            pl.BlockSpec((tile_n, c_pad), lambda i: (i, 0)),    # logits tile
            pl.BlockSpec((tile_n, 1), lambda i: (i, 0)),        # targets tile
        ],
        out_specs=pl.BlockSpec((tile_n, 1), lambda i: (i, 0)),  # per-row loss tile
        compiler_params=pltpu.CompilerParams(
            dimension_semantics=("parallel",),                  # v7x: both TCs stream tiles
            vmem_limit_bytes=32 * 1024 * 1024,                  # raise v5e's 16 MiB default
        ),
    )(logits_p, targets_p)

    # TODO(synk): for vocabularies too large for one (tile_n, C) block (e.g. C >= 128K
    # on v7x), add a class-axis grid dim with an online logsumexp instead of shrinking tile_n.
    return jnp.sum(row_losses[:n, 0]) * jnp.float32(1.0 / n)


def _reference(logits, targets, num_classes, epsilon):
    log_probs = jax.nn.log_softmax(logits.astype(jnp.float32), axis=1)
    one_hot = jax.nn.one_hot(targets, num_classes, dtype=jnp.float32)
    smooth = (1.0 - epsilon) * one_hot + epsilon / num_classes
    return jnp.sum(jnp.mean(-smooth * log_probs, axis=0))


if __name__ == "__main__":
    key = jax.random.PRNGKey(0)
    k1, k2 = jax.random.split(key)

    batch = 8
    num_classes = 32
    epsilon = 0.1

    logits = jax.random.normal(k1, (batch, num_classes), dtype=jnp.float32)
    targets = jax.random.randint(k2, (batch,), 0, num_classes, dtype=jnp.int32)

    # f32, single tile
    loss = jax.block_until_ready(
        cross_entropy_label_smooth(logits, targets, num_classes, epsilon))
    ref = _reference(logits, targets, num_classes, epsilon)
    assert jnp.allclose(loss, ref, atol=1e-5, rtol=1e-5), (loss, ref)

    # bf16 logits (halves HBM traffic; math stays f32 in-kernel)
    logits_bf16 = logits.astype(jnp.bfloat16)
    loss_bf16 = jax.block_until_ready(
        cross_entropy_label_smooth(logits_bf16, targets, num_classes, epsilon))
    ref_bf16 = _reference(logits_bf16.astype(jnp.float32), targets, num_classes, epsilon)
    assert jnp.allclose(loss_bf16, ref_bf16, atol=1e-4, rtol=1e-4), (loss_bf16, ref_bf16)

    # multi-tile path with batch padding (grid=3, last tile has 4 padded rows)
    k3, k4 = jax.random.split(k2)
    logits2 = jax.random.normal(k3, (20, num_classes), dtype=jnp.float32)
    targets2 = jax.random.randint(k4, (20,), 0, num_classes, dtype=jnp.int32)
    loss2 = jax.block_until_ready(
        cross_entropy_label_smooth(logits2, targets2, num_classes, epsilon, tile_rows=8))
    ref2 = _reference(logits2, targets2, num_classes, epsilon)
    assert jnp.allclose(loss2, ref2, atol=1e-5, rtol=1e-5), (loss2, ref2)

    print("KERNEL_OK")
</pallas_src>

<mosaic_0001>
module attributes {stable_mosaic.version = 11 : i64} {
  func.func @kernel(%arg0: i32, %arg1: memref<8x128xf32, #tpu.memory_space<vmem>>, %arg2: memref<8x1xi32, #tpu.memory_space<vmem>>, %arg3: memref<8x1xf32, #tpu.memory_space<vmem>>) attributes {dimension_semantics = [#tpu.dimension_semantics<parallel>], iteration_bounds = array<i64: 1>, scalar_prefetch = 0 : i64, scratch_operands = 0 : i64, tpu.core_type = #tpu.core_type<tc>, window_params = [{transform_indices = @transform_0, window_bounds = array<i64: 8, 128>}, {transform_indices = @transform_1, window_bounds = array<i64: 8, 1>}, {transform_indices = @transform_2, window_bounds = array<i64: 8, 1>}]} {
    %c0 = arith.constant 0 : index
    %c0_0 = arith.constant 0 : index
    %0 = vector.load %arg1[%c0, %c0_0] : memref<8x128xf32, #tpu.memory_space<vmem>>, vector<8x128xf32>
    %c0_1 = arith.constant 0 : index
    %c0_2 = arith.constant 0 : index
    %1 = vector.load %arg2[%c0_1, %c0_2] : memref<8x1xi32, #tpu.memory_space<vmem>>, vector<8x1xi32>
    %2 = tpu.iota {dimensions = array<i32: 1>} : vector<8x128xi32>
    %c32_i32 = arith.constant 32 : i32
    %3 = vector.broadcast %c32_i32 : i32 to vector<8x128xi32>
    %4 = arith.cmpi slt, %2, %3 : vector<8x128xi32>
    %cst = arith.constant -3.000000e+38 : f32
    %5 = vector.broadcast %cst : f32 to vector<8x128xf32>
    %6 = arith.select %4, %0, %5 : vector<8x128xi1>, vector<8x128xf32>
    %cst_3 = arith.constant dense<0xFF800000> : vector<8xf32>
    %7 = vector.multi_reduction <maximumf>, %6, %cst_3 [1] : vector<8x128xf32> to vector<8xf32>
    %8 = vector.shape_cast %7 : vector<8xf32> to vector<8x1xf32>
    %9 = vector.broadcast %8 : vector<8x1xf32> to vector<8x128xf32>
    %10 = arith.subf %0, %9 : vector<8x128xf32>
    %11 = math.exp %10 : vector<8x128xf32>
    %cst_4 = arith.constant 0.000000e+00 : f32
    %12 = vector.broadcast %cst_4 : f32 to vector<8x128xf32>
    %13 = arith.select %4, %11, %12 : vector<8x128xi1>, vector<8x128xf32>
    %cst_5 = arith.constant dense<0.000000e+00> : vector<8xf32>
    %14 = vector.multi_reduction <add>, %13, %cst_5 [1] : vector<8x128xf32> to vector<8xf32>
    %15 = vector.shape_cast %14 : vector<8xf32> to vector<8x1xf32>
    %16 = math.log %15 : vector<8x1xf32>
    %17 = arith.addf %8, %16 : vector<8x1xf32>
    %18 = vector.broadcast %1 : vector<8x1xi32> to vector<8x128xi32>
    %19 = arith.cmpi eq, %2, %18 : vector<8x128xi32>
    %cst_6 = arith.constant 0.000000e+00 : f32
    %20 = vector.broadcast %cst_6 : f32 to vector<8x128xf32>
    %21 = arith.select %19, %0, %20 : vector<8x128xi1>, vector<8x128xf32>
    %cst_7 = arith.constant dense<0.000000e+00> : vector<8xf32>
    %22 = vector.multi_reduction <add>, %21, %cst_7 [1] : vector<8x128xf32> to vector<8xf32>
    %23 = vector.shape_cast %22 : vector<8xf32> to vector<8x1xf32>
    %24 = arith.subf %23, %17 : vector<8x1xf32>
    %cst_8 = arith.constant 0.000000e+00 : f32
    %25 = vector.broadcast %cst_8 : f32 to vector<8x128xf32>
    %26 = arith.select %4, %0, %25 : vector<8x128xi1>, vector<8x128xf32>
    %cst_9 = arith.constant dense<0.000000e+00> : vector<8xf32>
    %27 = vector.multi_reduction <add>, %26, %cst_9 [1] : vector<8x128xf32> to vector<8xf32>
    %28 = vector.shape_cast %27 : vector<8xf32> to vector<8x1xf32>
    %cst_10 = arith.constant 3.200000e+01 : f32
    %29 = vector.broadcast %cst_10 : f32 to vector<8x1xf32>
    %30 = arith.mulf %29, %17 : vector<8x1xf32>
    %31 = arith.subf %28, %30 : vector<8x1xf32>
    %cst_11 = arith.constant 0.899999976 : f32
    %32 = vector.broadcast %cst_11 : f32 to vector<8x1xf32>
    %33 = arith.mulf %32, %24 : vector<8x1xf32>
    %cst_12 = arith.constant 3.125000e-03 : f32
    %34 = vector.broadcast %cst_12 : f32 to vector<8x1xf32>
    %35 = arith.mulf %34, %31 : vector<8x1xf32>
    %36 = arith.addf %33, %35 : vector<8x1xf32>
    %cst_13 = arith.constant 0.000000e+00 : f32
    %37 = vector.broadcast %cst_13 : f32 to vector<8x1xf32>
    %38 = arith.subf %37, %36 : vector<8x1xf32>
    %c0_14 = arith.constant 0 : index
    %c0_15 = arith.constant 0 : index
    %39 = vector.load %arg3[%c0_14, %c0_15] : memref<8x1xf32, #tpu.memory_space<vmem>>, vector<8x1xf32>
    tpu.vector_store %arg3[%c0_14, %c0_15], %38 {strides = array<i32>} : memref<8x1xf32, #tpu.memory_space<vmem>>, vector<8x1xf32>,
    return
  }
  func.func @transform_0(%arg0: i32) -> (i32, i32) {
    %c0_i32 = arith.constant 0 : i32
    %c0_i32_0 = arith.constant 0 : i32
    return %arg0, %c0_i32 : i32, i32
  }
  func.func @transform_1(%arg0: i32) -> (i32, i32) {
    %c0_i32 = arith.constant 0 : i32
    %c0_i32_0 = arith.constant 0 : i32
    return %arg0, %c0_i32 : i32, i32
  }
  func.func @transform_2(%arg0: i32) -> (i32, i32) {
    %c0_i32 = arith.constant 0 : i32
    %c0_i32_0 = arith.constant 0 : i32
    return %arg0, %c0_i32 : i32, i32
  }
}

</mosaic_0001>

<bundles_post_ra>
// kernel: tpu_custom_call.1
= control target key start
LH: loop header
LB: loop body
LE: loop exit
PB: predicated region body
PF: predicated region fallthrough
CT: control target
= control target key end

     0   :  { %v13_v0 = vlaneseq  ;;  %v57_v1 = vmov 0   ;;  %vm45_vm2 = vcmask 7168   ;;  %s85_s0 = inlined_call_operand.vmem [shape: f32[8,128], index: 0, kind: input, shape index: {}]   ;;  %s86_s1 = inlined_call_operand.vmem [shape: s32[8,1], index: 1, kind: input, shape index: {}]   ;;  %s87_s2 = inlined_call_operand.vmem [shape: f32[8,1], index: 2, kind: output, shape index: {}]  }
   0x1   :  { %52 = vset.pattern.permute.xlu0 %v57_v1  ;;  %v11_v2 = vld [vmem:[%s85_s0] sm:$0xff] }
   0x2   :  { %v14_v3 = vand.u32 127, %v13_v0  ;;  %v12_v5 = vld [vmem:[%s86_s1] sm:$0xff] }
   0x4   :  { %vm15_vm0 = vcmp.lt.s32.totalorder %v14_v3, 32 }
   0x5   :  { %v16_v4 = vsel %vm15_vm0, %v11_v2, -3e+38  ;;  %v36_v13 = vsel %vm15_vm0, %v11_v2, 0.0 }
   0x6   :  { %17 = vmax.xlane.f32.xlu0 %v16_v4 }
  0x1c   :  { %29 = vperm.xlu0 %52, %v12_v5  }
  0x8f   :  { %v18_v6 = vpop.xlane.xlu0 %17 }
  0x90   :  { %v19_v7 = vsub.f32 %v11_v2, %v18_v6 }
  0x92   :  { %v20_v8 = vmul.f32 1.442695, %v19_v7 }
  0x94   :  { %53 = vpow2.f32 %v20_v8 }
  0x97   :  { %v30_v9 = vpop.permute.xlu0 %29 }
  0x98   :  { %vm31_vm1 = vcmp.eq.s32.totalorder %v14_v3, %v30_v9 }
  0x99   :  { %v32_v12 = vsel %vm31_vm1, %v11_v2, 0.0 }
  0xa1   :  { %v54_v10 = vpop.eup %53 }
  0xa2   :  { %v22_v11 = vsel %vm15_vm0, %v54_v10, 0.0 }
  0xa3   :  { %23 = vadd.xlane.f32.xlu1 %v22_v11 }
  0xa7   :  { %33 = vadd.xlane.f32.xlu1 %v32_v12 }
  0xab   :  { %37 = vadd.xlane.f32.xlu1 %v36_v13 }
 0x12c   :  { %v24_v14 = vpop.xlane.xlu1 %23 }
 0x12d   :  { %55 = vlog2.f32 %v24_v14 }
 0x130   :  { %v34_v15 = vpop.xlane.xlu1 %33 }
 0x134   :  { %v38_v19 = vpop.xlane.xlu1 %37 }
 0x13a   :  { %v56_v16 = vpop.eup %55 }
 0x13b   :  { %v26_v17 = vmul.f32 0.6931472, %v56_v16 }
 0x13d   :  { %v27_v18 = vadd.f32 %v26_v17, %v18_v6 }
 0x13f   :  { %v35_v20 = vsub.f32 %v34_v15, %v27_v18  ;;  %v39_v21 = vmul.f32 32.0, %v27_v18 }
 0x141   :  { %v40_v22 = vsub.f32 %v38_v19, %v39_v21  ;;  %v41_v23 = vmul.f32 0.9, %v35_v20 }
 0x143   :  { %v42_v24 = vmul.f32 0.003125, %v40_v22 }
 0x145   :  { %v43_v25 = vadd.f32 %v42_v24, %v41_v23 }
 0x147   :  { %v44_v26 = vsub.f32 0.0, %v43_v25 }
 0x149   :  { %46 = vst.msk [vmem:[%s87_s2] sm:$0xff] %vm45_vm2, %v44_v26 }

</bundles_post_ra>
